<compile_context>
chip_gen: v5e
topology: v5e:2x2
jax: 0.10.0
libtpu: 0.0.40
codegen_flags: <defaults>
</compile_context>

<pallas_src>
import functools

import jax
import jax.numpy as jnp
from jax.experimental import pallas as pl
from jax.experimental.pallas import tpu as pltpu


def _ese_kernel(x_ref, wt_ref, b_ref, o_ref, *, inv_hw):
    # x_ref : (Bn, C, HWp)  -- Bn batch samples, spatial (padded) on lanes
    # wt_ref: (C, C)        -- conv weight transposed to (in_c, out_c)
    # b_ref : (1, C)        -- conv bias
    # o_ref : (Bn, C, HWp)

    # Global average pool over the lane axis, accumulated in f32.  Zero padding
    # in the lane axis does not affect the sum; scale by 1/HW (unpadded).
    se = jnp.sum(x_ref[...].astype(jnp.float32), axis=-1) * inv_hw        # (Bn, C)

    # 1x1 conv on the pooled vectors == (Bn, C) @ (C, C) + bias.
    fc = jnp.dot(se, wt_ref[...], preferred_element_type=jnp.float32) + b_ref[...]

    # hard_sigmoid (torch F.hardsigmoid): clamp((x + 3) / 6, 0, 1)
    gate = jnp.clip((fc + 3.0) / 6.0, 0.0, 1.0)                           # (Bn, C) f32

    # Re-read x in its native dtype; only the tiny gate gets cast.  Avoids a
    # full-tile f32 temp living across the matmul (VMEM/vreg pressure).
    x = x_ref[...]
    o_ref[...] = x * gate.astype(x.dtype)[:, :, None]


def _pick_batch_block(n, c, hwp, itemsize):
    """Largest Bn dividing N that fits the VMEM budget and keeps >=2 grid steps."""
    per_sample = c * hwp * itemsize
    budget = 10 * 1024 * 1024            # bytes per x block (4x with dbl-buffered in+out)
    bn = max(1, min(n, budget // max(per_sample, 1)))
    if n >= 2:
        bn = min(bn, max(1, n // 2))     # expose >=2 parallel iterations (v7x 2 TCs)
    while n % bn:
        bn -= 1
    return bn


def effective_se_module(x_nchw, weight, bias, *, vmem_limit_bytes=64 * 1024 * 1024):
    """x_nchw: (N, C, H, W); weight: (C_out, C_in, 1, 1); bias: (C_out,)."""
    N, C, H, W = x_nchw.shape
    HW = H * W
    HWp = ((HW + 127) // 128) * 128      # lane-dense last dim (unmasked stores)

    x = x_nchw.reshape(N, C, HW)
    if HWp != HW:
        x = jnp.pad(x, ((0, 0), (0, 0), (0, HWp - HW)))

    w_t = weight.reshape(C, C).T         # (in_c, out_c): kernel does se @ w_t
    b = bias.reshape(1, C)

    bn = _pick_batch_block(N, C, HWp, x.dtype.itemsize)
    kernel = functools.partial(_ese_kernel, inv_hw=1.0 / HW)

    out = pl.pallas_call(
        kernel,
        out_shape=jax.ShapeDtypeStruct((N, C, HWp), x.dtype),
        grid_spec=pltpu.PrefetchScalarGridSpec(
            num_scalar_prefetch=0,
            grid=(N // bn,),
            in_specs=[
                pl.BlockSpec((bn, C, HWp), lambda n: (n, 0, 0)),
                pl.BlockSpec((C, C), lambda n: (0, 0)),
                pl.BlockSpec((1, C), lambda n: (0, 0)),
            ],
            out_specs=pl.BlockSpec((bn, C, HWp), lambda n: (n, 0, 0)),
        ),
        compiler_params=pltpu.CompilerParams(
            dimension_semantics=("parallel",),
            vmem_limit_bytes=vmem_limit_bytes,
        ),
    )(x, w_t, b)

    if HWp != HW:
        out = out[:, :, :HW]
    return out.reshape(N, C, H, W)


def _reference(x, weight, bias):
    # pure-JAX reference of the PyTorch forward
    se = jnp.mean(x, axis=(2, 3), keepdims=True)                    # (N, C, 1, 1)
    w = weight.reshape(weight.shape[0], weight.shape[1])            # (out, in)
    fc = jnp.einsum('ncij,oc->noij', se, w) + bias[None, :, None, None]
    gate = jnp.clip((fc + 3.0) / 6.0, 0.0, 1.0)
    return x * gate


def _run_case(key, N, C, H, W):
    kx, kw, kb = jax.random.split(key, 3)
    x = jax.random.normal(kx, (N, C, H, W), dtype=jnp.float32)
    weight = jax.random.normal(kw, (C, C, 1, 1), dtype=jnp.float32) * 0.1
    bias = jax.random.normal(kb, (C,), dtype=jnp.float32) * 0.1

    out = effective_se_module(x, weight, bias)
    jax.block_until_ready(out)

    ref = _reference(x, weight, bias)
    assert out.shape == (N, C, H, W)
    assert jnp.allclose(out, ref, atol=1e-5, rtol=1e-5), \
        f"mismatch vs reference for shape {(N, C, H, W)}"


if __name__ == "__main__":
    key = jax.random.PRNGKey(0)
    k0, k1 = jax.random.split(key)

    # HW = 256 (lane-aligned), Bn batching path.
    _run_case(k0, N=2, C=4, H=16, W=16)
    # HW = 49 (not a multiple of 128) -> exercises lane padding path.
    _run_case(k1, N=2, C=8, H=7, W=7)

    print("KERNEL_OK")
</pallas_src>

<mosaic_0001>
module attributes {stable_mosaic.version = 11 : i64} {
  func.func @_ese_kernel(%arg0: i32, %arg1: memref<1x4x256xf32, #tpu.memory_space<vmem>>, %arg2: memref<4x4xf32, #tpu.memory_space<vmem>>, %arg3: memref<1x4xf32, #tpu.memory_space<vmem>>, %arg4: memref<1x4x256xf32, #tpu.memory_space<vmem>>) attributes {dimension_semantics = [#tpu.dimension_semantics<parallel>], iteration_bounds = array<i64: 2>, scalar_prefetch = 0 : i64, scratch_operands = 0 : i64, tpu.core_type = #tpu.core_type<tc>, window_params = [{transform_indices = @transform_0, window_bounds = array<i64: 1, 4, 256>}, {pipeline_mode = #tpu.pipeline_mode<synchronous>, transform_indices = @transform_1, window_bounds = array<i64: 4, 4>}, {pipeline_mode = #tpu.pipeline_mode<synchronous>, transform_indices = @transform_2, window_bounds = array<i64: 1, 4>}, {transform_indices = @transform_3, window_bounds = array<i64: 1, 4, 256>}]} {
    %c0 = arith.constant 0 : index
    %c0_0 = arith.constant 0 : index
    %c0_1 = arith.constant 0 : index
    %0 = vector.load %arg1[%c0, %c0_0, %c0_1] : memref<1x4x256xf32, #tpu.memory_space<vmem>>, vector<1x4x256xf32>
    %cst = arith.constant dense<0.000000e+00> : vector<1x4xf32>
    %1 = vector.multi_reduction <add>, %0, %cst [2] : vector<1x4x256xf32> to vector<1x4xf32>
    %cst_2 = arith.constant 3.906250e-03 : f32
    %2 = vector.broadcast %cst_2 : f32 to vector<1x4xf32>
    %3 = arith.mulf %1, %2 : vector<1x4xf32>
    %c0_3 = arith.constant 0 : index
    %c0_4 = arith.constant 0 : index
    %4 = vector.load %arg2[%c0_3, %c0_4] : memref<4x4xf32, #tpu.memory_space<vmem>>, vector<4x4xf32>
    %cst_5 = arith.constant dense<0.000000e+00> : vector<1x4xf32>
    %5 = tpu.matmul %3, %4, %cst_5 {dimension_numbers = #tpu.dot_dimension_numbers<[1], [0], [0], [1], [0, 0, 1, 1], [], []>} : vector<1x4xf32>, vector<4x4xf32>, vector<1x4xf32> -> vector<1x4xf32>
    %c0_6 = arith.constant 0 : index
    %c0_7 = arith.constant 0 : index
    %6 = vector.load %arg3[%c0_6, %c0_7] : memref<1x4xf32, #tpu.memory_space<vmem>>, vector<1x4xf32>
    %7 = arith.addf %5, %6 : vector<1x4xf32>
    %cst_8 = arith.constant 3.000000e+00 : f32
    %8 = vector.broadcast %cst_8 : f32 to vector<1x4xf32>
    %9 = arith.addf %7, %8 : vector<1x4xf32>
    %cst_9 = arith.constant 6.000000e+00 : f32
    %10 = vector.broadcast %cst_9 : f32 to vector<1x4xf32>
    %11 = arith.divf %9, %10 : vector<1x4xf32>
    %cst_10 = arith.constant 0.000000e+00 : f32
    %cst_11 = arith.constant 1.000000e+00 : f32
    %12 = vector.broadcast %cst_10 : f32 to vector<1x4xf32>
    %13 = arith.maximumf %12, %11 : vector<1x4xf32>
    %14 = vector.broadcast %cst_11 : f32 to vector<1x4xf32>
    %15 = arith.minimumf %14, %13 : vector<1x4xf32>
    %c0_12 = arith.constant 0 : index
    %c0_13 = arith.constant 0 : index
    %c0_14 = arith.constant 0 : index
    %16 = vector.load %arg1[%c0_12, %c0_13, %c0_14] : memref<1x4x256xf32, #tpu.memory_space<vmem>>, vector<1x4x256xf32>
    %17 = vector.shape_cast %15 : vector<1x4xf32> to vector<1x4x1xf32>
    %18 = vector.broadcast %17 : vector<1x4x1xf32> to vector<1x4x256xf32>
    %19 = arith.mulf %16, %18 : vector<1x4x256xf32>
    %c0_15 = arith.constant 0 : index
    %c0_16 = arith.constant 0 : index
    %c0_17 = arith.constant 0 : index
    %20 = vector.load %arg4[%c0_15, %c0_16, %c0_17] : memref<1x4x256xf32, #tpu.memory_space<vmem>>, vector<1x4x256xf32>
    tpu.vector_store %arg4[%c0_15, %c0_16, %c0_17], %19 {strides = array<i32>} : memref<1x4x256xf32, #tpu.memory_space<vmem>>, vector<1x4x256xf32>,
    return
  }
  func.func @transform_0(%arg0: i32) -> (i32, i32, i32) {
    %c0_i32 = arith.constant 0 : i32
    %c0_i32_0 = arith.constant 0 : i32
    %c0_i32_1 = arith.constant 0 : i32
    return %arg0, %c0_i32, %c0_i32_0 : i32, i32, i32
  }
  func.func @transform_1(%arg0: i32) -> (i32, i32) {
    %c0_i32 = arith.constant 0 : i32
    %c0_i32_0 = arith.constant 0 : i32
    %c0_i32_1 = arith.constant 0 : i32
    return %c0_i32, %c0_i32_0 : i32, i32
  }
  func.func @transform_2(%arg0: i32) -> (i32, i32) {
    %c0_i32 = arith.constant 0 : i32
    %c0_i32_0 = arith.constant 0 : i32
    %c0_i32_1 = arith.constant 0 : i32
    return %c0_i32, %c0_i32_0 : i32, i32
  }
  func.func @transform_3(%arg0: i32) -> (i32, i32, i32) {
    %c0_i32 = arith.constant 0 : i32
    %c0_i32_0 = arith.constant 0 : i32
    %c0_i32_1 = arith.constant 0 : i32
    return %arg0, %c0_i32, %c0_i32_0 : i32, i32, i32
  }
}

</mosaic_0001>

<bundles_post_ra>
// kernel: tpu_custom_call.1
= control target key start
LH: loop header
LB: loop body
LE: loop exit
PB: predicated region body
PF: predicated region fallthrough
CT: control target
= control target key end

     0   :  { %8 = vsyncpa [#allocation3], 0  ;;  %s755_s0 = inlined_call_operand.hbm [shape: f32[2,4,256], index: 0, kind: input, shape index: {}]   ;;  %s756_s1 = inlined_call_operand.hbm [shape: f32[4,4], index: 1, kind: input, shape index: {}]   ;;  %s757_s2 = inlined_call_operand.vmem [shape: f32[1,4], index: 2, kind: input, shape index: {}]   ;;  %s758_s3 = inlined_call_operand.hbm [shape: f32[2,4,256], index: 3, kind: output, shape index: {}]  }
   0x1   :  { %10 = vsyncpa [#allocation3 + $0x1], 0 }
   0x2   :  { %11 = vsyncpa [#allocation6], 0 }
   0x3   :  { %12 = vsyncpa [#allocation4], 0 }
   0x4   :  { %14 = vsyncpa [#allocation4 + $0x1], 0  ;;  %s610_s12 = smov 0   ;;  %s612_s13 = smov 0  }
   0x5   :  { %s614_s14 = smov 0   ;;  %s616_s15 = smov 0  }
   0x6 LB: > { %s631_s16 = sadd.s32 4294967295, %s585_s15   ;;  %s373_s17 = sadd.s32 4294967294, %s585_s15   ;;  %s585_s15 = sphi %s616_s15, %s768_s15   ;;  %s581_s14 = sphi %s614_s14, %s767_s14   ;;  %s577_s13 = sphi %s612_s13, %s766_s13   ;;  %s573_s12 = sphi %s610_s12, %s765_s12  }
   0x7   : > { %p40_p0 = scmp.ne.s32.totalorder %s577_s13, %s573_s12  ;;  %p41_p1 = scmp.eq.s32.totalorder %s631_s16, 0 }
   0x8   : > { %p106_p2 = scmp.eq.s32.totalorder %s631_s16, 1  ;;  %p112_p3 = scmp.eq.s32.totalorder %s373_s17, 1 }
   0x9   : > { %p640_p4 = por %p41_p1, %p40_p0  ;;  %p374_p5 = scmp.ge.s32.totalorder %s585_s15, 1 }
   0xa   : > { %p645_p6 = por %p112_p3, %p40_p0  ;;  %p119_p7 = scmp.lt.s32.totalorder %s585_s15, 3 }
   0xb   : > { %s131_s22 = sshll.u32 %s756_s1, 4  ;;  %s587_s24 = smov [#allocation5]   ;;  %s132_s22 = int_to_ptr.hbm [resolvable:$true] %s131_s22 }
   0xc   : > { %p653_p8 = pnand %p374_p5, %p119_p7  ;;  %s133_s25 = sshll.u32 %s587_s24, 4  ;;  %s134_s25 = int_to_ptr.vmem [resolvable:$true] %s133_s25 }
   0xd   : > { %s663_s26 = sadd.s32 1, %s585_s15   ;;  %s27_s27 = sadd.s32 1, %s581_s14 }
   0xe   : > { %p401_p10 = pneg %p653_p8  ;;  %s24_s28 = ssub.s32 %s585_s15, %s663_s26 }
   0xf   : > { %p25_p12 = scmp.eq.s32.totalorder %s24_s28, 0  ;;  %p34_p13 = scmp.ne.s32.totalorder %s581_s14, %s577_s13 }
  0x10   : > { %p402_p11 = pnand %p401_p10, %p41_p1  ;;  %p35_p0 = scmp.eq.s32.totalorder %s585_s15, 0 }
  0x11   : > { %s672_s29 = scalar_select %p25_p12, %s581_s14, %s27_s27  }
  0x12   : > { %404 = dma.hbm_to_vmem [thread:$0]  (!%p402_p11), %s132_s22, 64, %s134_s25, [#allocation6]  }
  0x13   : > { %p676_p3 = por %p106_p2, %p34_p13  ;;  %p414_p5 = scmp.lt.s32.totalorder %s585_s15, 2 }
  0x14   : > { %s147_s4 = sand.u32 1, %s581_s14   ;;  %s391_s5 = sshll.u32 %s585_s15, 3 }
  0x15   : > { %p36_p7 = por %p35_p0, %p34_p13  ;;  %s377_s6 = sshll.u32 %s147_s4, 3 }
  0x16   : > { %s156_s9 = scalar_lea.hbm %s755_s0, %s391_s5  ;;  %s151_s11 = scalar_lea.vmem [#allocation2], %s377_s6 }
  0x17   : > { %s158_s10 = sshll.u32 %s156_s9, 4  ;;  %s160_s17 = sshll.u32 %s151_s11, 4  ;;  %s159_s10 = int_to_ptr.hbm [resolvable:$true] %s158_s10  ;;  %s161_s17 = int_to_ptr.vmem [resolvable:$true] %s160_s17 }
  0x18   : > { %p686_p10 = pnand %p414_p5, %p36_p7  ;;  %s148_s21 = scalar_lea.sflag [#allocation3], %s147_s4 }
  0x19   : > { %s485_s22 = sshra.s32 %s159_s10, 4  ;;  %s492_s28 = scalar_lea.hbm %s755_s0, 16  ;;  %s486_s22 = int_to_ptr.hbm [resolvable:$true] %s485_s22 }
  0x1a   : > { %s487_s24 = scalar_lea.hbm %s486_s22, 8  ;;  %p489_p11 = pneg %p686_p10 }
  0x1b   : > { %p488_p2 = scmp.ne.s32.totalorder %s486_s22, %s487_s24  ;;  %p493_p0 = scmp.lt.s32.totalorder %s486_s22, %s755_s0 }
  0x1c   : > { %p494_p5 = scmp.lt.s32.totalorder %s492_s28, %s487_s24 }
  0x1d   : > { %p490_p12 = pnand %p489_p11, %p488_p2 }
  0x1e   : > { %p495_p7 = por %p494_p5, %p493_p0 }
  0x1f   : > { %p491_p13 = pneg %p490_p12 }
  0x21   : > { %p496_p9 = pnand %p495_p7, %p491_p13 }
  0x23   : > { %499 = shalt.err (!%p496_p9)
}
  0x24   : > { %408 = dma.hbm_to_vmem [thread:$0]  (!%p686_p10), %s159_s10, 128, %s161_s17, %s148_s21  }
  0x25   : > { %169 = sbr.rel (%p653_p8) target bundleno = 437 (0x1b5), region = 32  ;;  %s703_s4 = sand.u32 (!%p653_p8), 1, %s577_s13  }
  0x26   : > { %s381_s7 = sshll.u32 (!%p653_p8), %s703_s4, 3  ;;  %s172_s8 = scalar_lea.sflag (!%p653_p8), [#allocation3], %s703_s4 }
  0x27   : > { %s175_s9 = scalar_lea.vmem (!%p653_p8), [#allocation2], %s381_s7 }
  0x2a   : > { %560 = dma.done.wait (%p640_p4), %s172_s8, 128  }
  0x2b   : > { %562 = vsyncadd (%p640_p4), %s172_s8, 4294967168 }
  0x2c   : > { %564 = dma.done.wait (%p41_p1), [#allocation6], 64  }
  0x2d   : > { %566 = vsyncadd (%p41_p1), [#allocation6], 4294967232  ;;  %v204_v0 = vld [vmem:[%s175_s9] sm:$0xff]  ;;  %vm211_vm0 = vcmask 1043456   ;;  %v218_v6 = vld [vmem:[#allocation5] sm:$0xf]  ;;  %v221_v7 = vlaneseq }
  0x2e   : > { %206 = vst [vmem:[#allocation1] ss:$2 sm:$0xff] %v204_v0  ;;  %384 = vmatpush.msk.msra.mxu0 %vm211_vm0, %v218_v6  ;;  %vm224_vm1 = vcmask 31744   ;;  %v588_v13 = vmov 6.0   ;;  %v219_v18 = vld [vmem:[%s757_s2] sm:$0x1] }
  0x2f   : > { %v222_v8 = vand.u32 127, %v221_v7  ;;  %v263_v12 = vshrl.u32 %v221_v7, 7  ;;  %453 = vrcp.f32 %v588_v13  ;;  %v589_v28 = vmov 839922192   ;;  %s392_s10 = sshll.u32 %s631_s16, 3  ;;  %s203_s21 = scalar_lea.vmem [#allocation7], %s381_s7 }
  0x30   : > { %v270_v29 = vunpack.c.l.s4 %v589_v28  ;;  %s288_s20 = scalar_lea.hbm %s758_s3, %s392_s10  ;;  %s290_s22 = sshll.u32 %s203_s21, 4  ;;  %s291_s22 = int_to_ptr.vmem [resolvable:$true] %s290_s22 }
  0x31   : > { %452 = vset.pattern.permute.xlu0 %v263_v12  ;;  %s292_s24 = sshll.u32 %s288_s20, 4  ;;  %s277_s25 = scalar_lea.sflag [#allocation4], %s703_s4  ;;  %s293_s24 = int_to_ptr.hbm [resolvable:$true] %s292_s24 }
  0x32   : > { %v271_v30 = vunpack.c.0.s8 %v270_v29  ;;  %s529_s27 = sshra.s32 %s293_s24, 4  ;;  %s535_s6 = scalar_lea.hbm %s758_s3, 16  ;;  %s530_s27 = int_to_ptr.hbm [resolvable:$true] %s529_s27 }
  0x33   : > { %s531_s16 = scalar_lea.hbm %s530_s27, 8  ;;  %p536_p9 = scmp.lt.s32.totalorder %s530_s27, %s758_s3 }
  0x34   : > { %p532_p1 = scmp.ne.s32.totalorder %s530_s27, %s531_s16  ;;  %p537_p10 = scmp.lt.s32.totalorder %s535_s6, %s531_s16 }
  0x35   : > { %v207_v1 = vld.sshfl [vmem:[#allocation1] sm:$0xff pattern:$0x75316420]  ;;  %v208_v2 = vld.sshfl [vmem:[#allocation1 + $0x8] sm:$0xff pattern:$0x75316420]  ;;  %v454_v14 = vpop.eup %453 }
  0x36   : > { %v212_v3 = vsel %vm211_vm0, %v207_v1, 0.0  ;;  %v213_v4 = vsel %vm211_vm0, %v208_v2, 0.0  ;;  %v252_v15 = vmul.f32 6.0, %v454_v14  ;;  %vm256_vm2 = vweird.f32 %v454_v14  ;;  %p533_p4 = pnand %p532_p1, %p676_p3  ;;  %p538_p2 = por %p537_p10, %p536_p9 }
  0x37   : > { %v214_v5 = vadd.f32 %v213_v4, %v212_v3 }
  0x38   : > { %v253_v16 = vsub.f32 1.0, %v252_v15  ;;  %p534_p8 = pneg %p533_p4 }
  0x39   : > { %215 = vadd.xlane.f32.xlu0 %v214_v5 }
  0x3a   : > { %v254_v17 = vmul.f32 %v454_v14, %v253_v16  ;;  %p539_p11 = pnand %p538_p2, %p534_p8 }
  0x3c   : > { %v255_v19 = vadd.f32 %v454_v14, %v254_v17 }
  0x3e   : > { %v257_v22 = vsel %vm256_vm2, %v454_v14, %v255_v19 }
  0xac   : > { %v216_v9 = vpop.xlane.xlu0 %215 }
  0xad   : > { %v217_v10 = vmul.f32 0.00390625, %v216_v9 }
  0xaf   : > { %v223_v11 = vperm.slane %v217_v10, %v222_v8 }
  0xb1   : > { %385 = vmatmul.msk.f32.vlgmr.msra.gmra.mxu0 %vm224_vm1, %v223_v11 }
 0x12e   : > { %v247_v20 = vpop.f32.mrf.mxu0 }
 0x12f   : > { %v248_v21 = vadd.f32 %v247_v20, %v219_v18 }
 0x131   : > { %v250_v23 = vadd.f32 3.0, %v248_v21 }
 0x133   : > { %v258_v24 = vmul.f32 %v257_v22, %v250_v23 }
 0x135   : > { %v259_v25 = vmax.f32 %v258_v24, 0.0 }
 0x137   : > { %v260_v26 = vmin.f32 %v259_v25, 1.0 }
 0x139   : > { %v261_v27 = vperm.slane %v260_v26, 0 }
 0x13b   : > { %266 = vperm.xlu0 %452, %v261_v27  }
 0x1ad   : > { %v267_v31 = vpop.permute.xlu0 %266 }
 0x1ae   : > { %v272_v32 = vperm.slane %v267_v31, %v271_v30 }
 0x1b0   : > { %v274_v33 = vmul.f32 %v272_v32, %v204_v0 }
 0x1b2   : > { %275 = vst [vmem:[%s203_s21] sm:$0xff] %v274_v33 }
 0x1b3   : > { %542 = shalt.err (!%p539_p11)
}
 0x1b4   : > { %399 = dma.vmem_to_hbm [thread:$0]  (%p676_p3), %s291_s22, 128, %s293_s24, %s277_s25  }
 0x1b5 PF: > { %s304_s4 = sand.u32 1, %s573_s12   ;;  %p764_p12 = scmp.ge.s32.totalorder %s585_s15, 2 }
 0x1b6   : > { %s305_s9 = scalar_lea.sflag [#allocation4], %s304_s4 }
 0x1b7   : > { %p410_p13 = pnand %p764_p12, %p645_p6 }
 0x1b9   : > { %p411_p0 = pneg %p410_p13 }
 0x1bb   : > { %568 = dma.done.wait (%p411_p0), %s305_s9, 128  }
 0x1bc   : > { %570 = vsyncadd (%p411_p0), %s305_s9, 4294967168  ;;  %p17_p5 = scmp.ge.s32.totalorder %s663_s26, 4   ;;  %s765_s12 = smov %s577_s13 }
 0x1bd   : > { %s766_s13 = smov %s581_s14  ;;  %s767_s14 = smov %s672_s29 }
 0x1be   : > { %s768_s15 = smov %s663_s26  ;;  %19 = sbr.rel (!%p17_p5) target bundleno = 6 (0x6), region = 81 }
 0x1c3   :  { %311 = vsyncpa [#allocation3], 1 }
 0x1c4   :  { %313 = vsyncpa [#allocation3 + $0x1], 1 }
 0x1c5   :  { %314 = vsyncpa [#allocation6], 1 }
 0x1c6   :  { %315 = vsyncpa [#allocation4], 1 }
 0x1c7   :  { %317 = vsyncpa [#allocation4 + $0x1], 1 }

</bundles_post_ra>
